<compile_context>
chip_gen: v7x
topology: tpu7x:2x2x1
jax: 0.10.0
libtpu: 0.0.40
codegen_flags: <defaults>
</compile_context>

<pallas_src>
import jax
import jax.numpy as jnp
from jax import lax
from jax.experimental import pallas as pl
from jax.experimental.pallas import tpu as pltpu


def mlp_kernel(x_ref,
               w1_ref, b1_ref,
               w2_ref, b2_ref,
               w3_ref, b3_ref,
               w4_ref, b4_ref,
               o_ref):
    # x_ref: (tile_b, in_dim) f32 (native layout)
    # w*:    (out, in) bf16 ; b*: (out, 1) f32 ; o_ref: (1, tile_b) f32
    x = x_ref[...].astype(jnp.bfloat16)

    # fc1 + sigmoid: (8, in) x (tile_b, in)^T -> (8, tile_b)
    # Transpose is folded into the dot_general (contract dim 1 of both).
    h = lax.dot_general(
        w1_ref[...], x,
        dimension_numbers=(((1,), (1,)), ((), ())),
        preferred_element_type=jnp.float32) + b1_ref[...]
    h = jax.nn.sigmoid(h)
    # dropoutMiddle -> identity (inference)

    # fc2 + sigmoid -> (16, tile_b)
    h = jnp.dot(w2_ref[...], h.astype(w2_ref.dtype),
                preferred_element_type=jnp.float32) + b2_ref[...]
    h = jax.nn.sigmoid(h)
    # dropoutMiddle -> identity (inference)

    # fc3 + sigmoid -> (8, tile_b)
    h = jnp.dot(w3_ref[...], h.astype(w3_ref.dtype),
                preferred_element_type=jnp.float32) + b3_ref[...]
    h = jax.nn.sigmoid(h)
    # dropoutEnd -> identity (inference)

    # fc4 (no activation) -> (1, tile_b), lane-dense output row
    o_ref[...] = (jnp.dot(w4_ref[...], h.astype(w4_ref.dtype),
                          preferred_element_type=jnp.float32)
                  + b4_ref[...]).astype(o_ref.dtype)


def _pick_tile_b(B):
    """Multiple of 256 (v6e/v7x MXU N width), aiming for >=4 grid steps
    (v7x has 2 TensorCores), capped at 4096."""
    t = ((pl.cdiv(B, 4) + 255) // 256) * 256
    return int(max(256, min(t, 4096)))


def neural_network_forward(x, params, *, tile_b=None):
    """x: (B, input_size) float32, native layout (no wrapper transpose/pad/cast).

    params: PyTorch-native layout — w{i}: (out, in) f32, b{i}: (out,) f32.
    Returns (B, 1) float32, matching NeuralNetwork.forward in eval mode.
    """
    B, in_dim = x.shape
    if tile_b is None:
        tile_b = _pick_tile_b(B)
    assert tile_b % 256 == 0, "tile_b must be a multiple of 256"

    n_blk = pl.cdiv(B, tile_b)   # ragged B handled by Pallas last-block padding

    # Weights stream as bf16 (tiny); biases kept f32, added to the f32 MXU result.
    w = [params[f"w{i}"].astype(jnp.bfloat16) for i in (1, 2, 3, 4)]
    b = [params[f"b{i}"].reshape(-1, 1).astype(jnp.float32) for i in (1, 2, 3, 4)]

    def full_spec(arr):
        # Weights / biases: same (whole-array) block at every grid step.
        return pl.BlockSpec(arr.shape, lambda i: (0, 0))

    out = pl.pallas_call(
        mlp_kernel,
        out_shape=jax.ShapeDtypeStruct((1, B), jnp.float32),
        grid_spec=pltpu.PrefetchScalarGridSpec(
            num_scalar_prefetch=0,
            grid=(n_blk,),
            in_specs=[
                pl.BlockSpec((tile_b, in_dim), lambda i: (i, 0)),   # x, native layout
                full_spec(w[0]), full_spec(b[0]),
                full_spec(w[1]), full_spec(b[1]),
                full_spec(w[2]), full_spec(b[2]),
                full_spec(w[3]), full_spec(b[3]),
            ],
            out_specs=pl.BlockSpec((1, tile_b), lambda i: (0, i)),
        ),
        compiler_params=pltpu.CompilerParams(
            dimension_semantics=("parallel",)),
    )(x, w[0], b[0], w[1], b[1], w[2], b[2], w[3], b[3])

    return out.T                                    # (B, 1) f32


def init_params(key, input_size):
    """PyTorch nn.Linear default init: U[-1/sqrt(fan_in), 1/sqrt(fan_in)].

    Weights in PyTorch-native (out_features, in_features) layout.
    """
    dims = [(input_size, 8), (8, 16), (16, 8), (8, 1)]
    params = {}
    for idx, (fan_in, fan_out) in enumerate(dims, start=1):
        key, kw, kb = jax.random.split(key, 3)
        bound = 1.0 / (fan_in ** 0.5)
        params[f"w{idx}"] = jax.random.uniform(
            kw, (fan_out, fan_in), jnp.float32, -bound, bound)
        params[f"b{idx}"] = jax.random.uniform(
            kb, (fan_out,), jnp.float32, -bound, bound)
    return params


def reference_forward(x, params):
    """Pure-JAX reference mimicking the kernel's bf16-matmul / f32-accumulate flow."""
    def lin(h, w, b):
        return jnp.dot(h.astype(jnp.bfloat16), w.T.astype(jnp.bfloat16),
                       preferred_element_type=jnp.float32) + b
    h = jax.nn.sigmoid(lin(x, params["w1"], params["b1"]))
    h = jax.nn.sigmoid(lin(h, params["w2"], params["b2"]))
    h = jax.nn.sigmoid(lin(h, params["w3"], params["b3"]))
    return lin(h, params["w4"], params["b4"])


if __name__ == "__main__":
    key = jax.random.PRNGKey(0)
    key, kx = jax.random.split(key)

    batch = 512          # -> tile_b=256, 2 "parallel" grid steps (v7x TC sharding)
    input_size = 32
    x = jax.random.normal(kx, (batch, input_size), jnp.float32)
    params = init_params(key, input_size)

    out = neural_network_forward(x, params)
    out = jax.block_until_ready(out)

    ref = reference_forward(x, params)
    assert out.shape == (batch, 1)
    assert jnp.allclose(out, ref, atol=1e-2, rtol=1e-2), "mismatch vs JAX reference"

    print("KERNEL_OK")
</pallas_src>

<mosaic_0001>
module attributes {stable_mosaic.version = 11 : i64} {
  func.func @mlp_kernel(%arg0: i32, %arg1: memref<256x32xf32, #tpu.memory_space<vmem>>, %arg2: memref<8x32xbf16, #tpu.memory_space<vmem>>, %arg3: memref<8x1xf32, #tpu.memory_space<vmem>>, %arg4: memref<16x8xbf16, #tpu.memory_space<vmem>>, %arg5: memref<16x1xf32, #tpu.memory_space<vmem>>, %arg6: memref<8x16xbf16, #tpu.memory_space<vmem>>, %arg7: memref<8x1xf32, #tpu.memory_space<vmem>>, %arg8: memref<1x8xbf16, #tpu.memory_space<vmem>>, %arg9: memref<1x1xf32, #tpu.memory_space<vmem>>, %arg10: memref<1x256xf32, #tpu.memory_space<vmem>>) attributes {dimension_semantics = [#tpu.dimension_semantics<parallel>], iteration_bounds = array<i64: 2>, scalar_prefetch = 0 : i64, scratch_operands = 0 : i64, tpu.core_type = #tpu.core_type<tc>, window_params = [{transform_indices = @transform_0, window_bounds = array<i64: 256, 32>}, {pipeline_mode = #tpu.pipeline_mode<synchronous>, transform_indices = @transform_1, window_bounds = array<i64: 8, 32>}, {pipeline_mode = #tpu.pipeline_mode<synchronous>, transform_indices = @transform_2, window_bounds = array<i64: 8, 1>}, {pipeline_mode = #tpu.pipeline_mode<synchronous>, transform_indices = @transform_3, window_bounds = array<i64: 16, 8>}, {pipeline_mode = #tpu.pipeline_mode<synchronous>, transform_indices = @transform_4, window_bounds = array<i64: 16, 1>}, {pipeline_mode = #tpu.pipeline_mode<synchronous>, transform_indices = @transform_5, window_bounds = array<i64: 8, 16>}, {pipeline_mode = #tpu.pipeline_mode<synchronous>, transform_indices = @transform_6, window_bounds = array<i64: 8, 1>}, {pipeline_mode = #tpu.pipeline_mode<synchronous>, transform_indices = @transform_7, window_bounds = array<i64: 1, 8>}, {pipeline_mode = #tpu.pipeline_mode<synchronous>, transform_indices = @transform_8, window_bounds = array<i64: 1, 1>}, {transform_indices = @transform_9, window_bounds = array<i64: 1, 256>}]} {
    %c0 = arith.constant 0 : index
    %c0_0 = arith.constant 0 : index
    %0 = vector.load %arg1[%c0, %c0_0] : memref<256x32xf32, #tpu.memory_space<vmem>>, vector<256x32xf32>
    %1 = arith.truncf %0 : vector<256x32xf32> to vector<256x32xbf16>
    %c0_1 = arith.constant 0 : index
    %c0_2 = arith.constant 0 : index
    %2 = vector.load %arg2[%c0_1, %c0_2] : memref<8x32xbf16, #tpu.memory_space<vmem>>, vector<8x32xbf16>
    %cst = arith.constant dense<0.000000e+00> : vector<8x256xf32>
    %3 = tpu.matmul %2, %1, %cst {dimension_numbers = #tpu.dot_dimension_numbers<[1], [1], [0], [0], [0, 0, 1, 0], [], []>} : vector<8x32xbf16>, vector<256x32xbf16>, vector<8x256xf32> -> vector<8x256xf32>
    %c0_3 = arith.constant 0 : index
    %c0_4 = arith.constant 0 : index
    %4 = vector.load %arg3[%c0_3, %c0_4] : memref<8x1xf32, #tpu.memory_space<vmem>>, vector<8x1xf32>
    %5 = vector.broadcast %4 : vector<8x1xf32> to vector<8x256xf32>
    %6 = arith.addf %3, %5 : vector<8x256xf32>
    %7 = arith.negf %6 : vector<8x256xf32>
    %8 = math.exp %7 : vector<8x256xf32>
    %cst_5 = arith.constant 1.000000e+00 : f32
    %9 = vector.broadcast %cst_5 : f32 to vector<8x256xf32>
    %10 = arith.addf %9, %8 : vector<8x256xf32>
    %11 = arith.divf %9, %10 : vector<8x256xf32>
    %c0_6 = arith.constant 0 : index
    %c0_7 = arith.constant 0 : index
    %12 = vector.load %arg4[%c0_6, %c0_7] : memref<16x8xbf16, #tpu.memory_space<vmem>>, vector<16x8xbf16>
    %13 = arith.truncf %11 : vector<8x256xf32> to vector<8x256xbf16>
    %cst_8 = arith.constant dense<0.000000e+00> : vector<16x256xf32>
    %14 = tpu.matmul %12, %13, %cst_8 {dimension_numbers = #tpu.dot_dimension_numbers<[1], [0], [0], [1], [0, 0, 1, 1], [], []>} : vector<16x8xbf16>, vector<8x256xbf16>, vector<16x256xf32> -> vector<16x256xf32>
    %c0_9 = arith.constant 0 : index
    %c0_10 = arith.constant 0 : index
    %15 = vector.load %arg5[%c0_9, %c0_10] : memref<16x1xf32, #tpu.memory_space<vmem>>, vector<16x1xf32>
    %16 = vector.broadcast %15 : vector<16x1xf32> to vector<16x256xf32>
    %17 = arith.addf %14, %16 : vector<16x256xf32>
    %18 = arith.negf %17 : vector<16x256xf32>
    %19 = math.exp %18 : vector<16x256xf32>
    %cst_11 = arith.constant 1.000000e+00 : f32
    %20 = vector.broadcast %cst_11 : f32 to vector<16x256xf32>
    %21 = arith.addf %20, %19 : vector<16x256xf32>
    %22 = arith.divf %20, %21 : vector<16x256xf32>
    %c0_12 = arith.constant 0 : index
    %c0_13 = arith.constant 0 : index
    %23 = vector.load %arg6[%c0_12, %c0_13] : memref<8x16xbf16, #tpu.memory_space<vmem>>, vector<8x16xbf16>
    %24 = arith.truncf %22 : vector<16x256xf32> to vector<16x256xbf16>
    %cst_14 = arith.constant dense<0.000000e+00> : vector<8x256xf32>
    %25 = tpu.matmul %23, %24, %cst_14 {dimension_numbers = #tpu.dot_dimension_numbers<[1], [0], [0], [1], [0, 0, 1, 1], [], []>} : vector<8x16xbf16>, vector<16x256xbf16>, vector<8x256xf32> -> vector<8x256xf32>
    %c0_15 = arith.constant 0 : index
    %c0_16 = arith.constant 0 : index
    %26 = vector.load %arg7[%c0_15, %c0_16] : memref<8x1xf32, #tpu.memory_space<vmem>>, vector<8x1xf32>
    %27 = vector.broadcast %26 : vector<8x1xf32> to vector<8x256xf32>
    %28 = arith.addf %25, %27 : vector<8x256xf32>
    %29 = arith.negf %28 : vector<8x256xf32>
    %30 = math.exp %29 : vector<8x256xf32>
    %cst_17 = arith.constant 1.000000e+00 : f32
    %31 = vector.broadcast %cst_17 : f32 to vector<8x256xf32>
    %32 = arith.addf %31, %30 : vector<8x256xf32>
    %33 = arith.divf %31, %32 : vector<8x256xf32>
    %c0_18 = arith.constant 0 : index
    %c0_19 = arith.constant 0 : index
    %34 = vector.load %arg8[%c0_18, %c0_19] : memref<1x8xbf16, #tpu.memory_space<vmem>>, vector<1x8xbf16>
    %35 = arith.truncf %33 : vector<8x256xf32> to vector<8x256xbf16>
    %cst_20 = arith.constant dense<0.000000e+00> : vector<1x256xf32>
    %36 = tpu.matmul %34, %35, %cst_20 {dimension_numbers = #tpu.dot_dimension_numbers<[1], [0], [0], [1], [0, 0, 1, 1], [], []>} : vector<1x8xbf16>, vector<8x256xbf16>, vector<1x256xf32> -> vector<1x256xf32>
    %c0_21 = arith.constant 0 : index
    %c0_22 = arith.constant 0 : index
    %37 = vector.load %arg9[%c0_21, %c0_22] : memref<1x1xf32, #tpu.memory_space<vmem>>, vector<1x1xf32>
    %38 = vector.broadcast %37 : vector<1x1xf32> to vector<1x256xf32>
    %39 = arith.addf %36, %38 : vector<1x256xf32>
    %c0_23 = arith.constant 0 : index
    %c0_24 = arith.constant 0 : index
    %40 = vector.load %arg10[%c0_23, %c0_24] : memref<1x256xf32, #tpu.memory_space<vmem>>, vector<1x256xf32>
    tpu.vector_store %arg10[%c0_23, %c0_24], %39 {strides = array<i32>} : memref<1x256xf32, #tpu.memory_space<vmem>>, vector<1x256xf32>,
    return
  }
  func.func @transform_0(%arg0: i32) -> (i32, i32) {
    %c0_i32 = arith.constant 0 : i32
    %c0_i32_0 = arith.constant 0 : i32
    return %arg0, %c0_i32 : i32, i32
  }
  func.func @transform_1(%arg0: i32) -> (i32, i32) {
    %c0_i32 = arith.constant 0 : i32
    %c0_i32_0 = arith.constant 0 : i32
    %c0_i32_1 = arith.constant 0 : i32
    return %c0_i32, %c0_i32_0 : i32, i32
  }
  func.func @transform_2(%arg0: i32) -> (i32, i32) {
    %c0_i32 = arith.constant 0 : i32
    %c0_i32_0 = arith.constant 0 : i32
    %c0_i32_1 = arith.constant 0 : i32
    return %c0_i32, %c0_i32_0 : i32, i32
  }
  func.func @transform_3(%arg0: i32) -> (i32, i32) {
    %c0_i32 = arith.constant 0 : i32
    %c0_i32_0 = arith.constant 0 : i32
    %c0_i32_1 = arith.constant 0 : i32
    return %c0_i32, %c0_i32_0 : i32, i32
  }
  func.func @transform_4(%arg0: i32) -> (i32, i32) {
    %c0_i32 = arith.constant 0 : i32
    %c0_i32_0 = arith.constant 0 : i32
    %c0_i32_1 = arith.constant 0 : i32
    return %c0_i32, %c0_i32_0 : i32, i32
  }
  func.func @transform_5(%arg0: i32) -> (i32, i32) {
    %c0_i32 = arith.constant 0 : i32
    %c0_i32_0 = arith.constant 0 : i32
    %c0_i32_1 = arith.constant 0 : i32
    return %c0_i32, %c0_i32_0 : i32, i32
  }
  func.func @transform_6(%arg0: i32) -> (i32, i32) {
    %c0_i32 = arith.constant 0 : i32
    %c0_i32_0 = arith.constant 0 : i32
    %c0_i32_1 = arith.constant 0 : i32
    return %c0_i32, %c0_i32_0 : i32, i32
  }
  func.func @transform_7(%arg0: i32) -> (i32, i32) {
    %c0_i32 = arith.constant 0 : i32
    %c0_i32_0 = arith.constant 0 : i32
    %c0_i32_1 = arith.constant 0 : i32
    return %c0_i32, %c0_i32_0 : i32, i32
  }
  func.func @transform_8(%arg0: i32) -> (i32, i32) {
    %c0_i32 = arith.constant 0 : i32
    %c0_i32_0 = arith.constant 0 : i32
    %c0_i32_1 = arith.constant 0 : i32
    return %c0_i32, %c0_i32_0 : i32, i32
  }
  func.func @transform_9(%arg0: i32) -> (i32, i32) {
    %c0_i32 = arith.constant 0 : i32
    %c0_i32_0 = arith.constant 0 : i32
    return %c0_i32, %arg0 : i32, i32
  }
}

</mosaic_0001>

<bundles_post_ra>
// kernel: tpu_custom_call.1
= control target key start
LH: loop header
LB: loop body
LE: loop exit
PB: predicated region body
PF: predicated region fallthrough
CT: control target
= control target key end

     0   :  { %s1262_s0 = inlined_call_operand.vmem [shape: f32[512,32], index: 0, kind: input, shape index: {}]   ;;  %s1263_s1 = inlined_call_operand.vmem [shape: bf16[8,32], index: 1, kind: input, shape index: {}]   ;;  %s1264_s2 = inlined_call_operand.vmem [shape: f32[8,1], index: 2, kind: input, shape index: {}]   ;;  %s1265_s3 = inlined_call_operand.vmem [shape: bf16[16,8], index: 3, kind: input, shape index: {}]   ;;  %s1266_s4 = inlined_call_operand.vmem [shape: f32[16,1], index: 4, kind: input, shape index: {}]   ;;  %s1267_s5 = inlined_call_operand.vmem [shape: bf16[8,16], index: 5, kind: input, shape index: {}]   ;;  %s1268_s6 = inlined_call_operand.vmem [shape: f32[8,1], index: 6, kind: input, shape index: {}]   ;;  %s1269_s7 = inlined_call_operand.vmem [shape: bf16[1,8], index: 7, kind: input, shape index: {}]   ;;  %s1270_s8 = inlined_call_operand.<no memory space> [shape: f32[1,1], index: 8, kind: input, shape index: {}]   ;;  %s1271_s9 = inlined_call_operand.hbm [shape: f32[1,512], index: 9, kind: output, shape index: {}]  }
   0x1   :  { %v14_v0 = vstv %s1270_s8 }
   0x2   :  { %15 = vst [vmem:[#allocation2] sm:$0x1] %v14_v0 }
   0x3   :  { %16 = vsyncpa [#allocation4], 0 }
   0x4   :  { %18 = vsyncpa [#allocation4 + $0x1], 0  ;;  %s1072_s11 = smov 0   ;;  %s1074_s12 = smov 0  }
   0x5   :  { %s1076_s13 = smov 0   ;;  %s1078_s14 = smov 0  }
   0x6 LB: > { %s821_s8 = sadd.s32 4294967295, %s1014_s14   ;;  %s822_s15 = sadd.s32 4294967294, %s1014_s14   ;;  %s1014_s14 = sphi %s1078_s14, %s1277_s14   ;;  %s1010_s13 = sphi %s1076_s13, %s1276_s13   ;;  %s1006_s12 = sphi %s1074_s12, %s1275_s12   ;;  %s1002_s11 = sphi %s1072_s11, %s1274_s11  }
   0x7   : > { %s1095_s16 = sadd.s32 1, %s1014_s14   ;;  %s225_s17 = sadd.s32 1, %s1010_s13 }
   0x8   : > { %s222_s18 = ssub.s32 %s1014_s14, %s1095_s16  ;;  %p235_p0 = scmp.ne.s32.totalorder %s1010_s13, %s1006_s12 }
   0x9   : > { %p223_p1 = scmp.eq.s32.totalorder %s222_s18, 0  ;;  %p236_p2 = scmp.eq.s32.totalorder %s821_s8, 1 }
   0xa   : > { %p241_p3 = scmp.ne.s32.totalorder %s1006_s12, %s1002_s11  ;;  %p242_p4 = scmp.eq.s32.totalorder %s822_s15, 1 }
   0xb   : > { %s1105_s19 = scalar_select %p223_p1, %s1010_s13, %s225_s17  }
   0xc   : > { %p1107_p5 = por %p236_p2, %p235_p0  ;;  %p1111_p6 = por %p242_p4, %p241_p3 }
   0xd   : > { %p825_p7 = scmp.ge.s32.totalorder %s1014_s14, 1  ;;  %p293_p8 = scmp.lt.s32.totalorder %s1014_s14, 3 }
   0xf   : > { %p294_p9 = pnand %p825_p7, %p293_p8 }
  0x10   : > { %s1117_s22 = sshll.u32 (!%p294_p9), %s821_s8, 5  ;;  %vm392_vm0 = vcmask (!%p294_p9), 261120   ;;  %v1122_v1 = vld [vmem:[%s1263_s1] sm:$0xf] (!%p294_p9)  ;;  %v1016_v3 = vmov (!%p294_p9), 0   ;;  %v502_v62 = vld [vmem:[%s1266_s4 + $0x8] sm:$0xff] (!%p294_p9) }
  0x11   : > { %297 = sbr.rel (%p294_p9) target bundleno = 1074 (0x432), region = 56  ;;  %v386_v2 = vld [vmem:[%s1264_s2] sm:$0xff] (!%p294_p9)  ;;  %p330_p10 = scmp.lt.s32.totalorder (!%p294_p9), %s1117_s22, 63  ;;  %866 = vmatprep.mubr.msk.bf16.mxu0 (!%p294_p9), %vm392_vm0, %v1122_v1  ;;  %917 = vset.pattern.permute.xlu0 (!%p294_p9), %v1016_v3  ;;  %vm522_vm1 = vcmask (!%p294_p9), 1043456   ;;  %vm518_vm2 = vcmask (!%p294_p9), 64512   ;;  %vm605_vm3 = vcmask (!%p294_p9), 130048  }
  0x12   : > { %389 = vperm.xlu0 (!%p294_p9), %917, %v386_v2   ;;  %561 = vmatprep.mubr.bf16.mxu1 (!%p294_p9), %v1016_v3  ;;  %v501_v4 = vld [vmem:[%s1266_s4] sm:$0xff] (!%p294_p9)  ;;  %s326_s10 = sand.u32 (!%p294_p9), 1, %s1006_s12   ;;  %s1220_s24 = scalar_lea.hbm (!%p294_p9), %s1271_s9, %s1117_s22 }
  0x13   : > { %918 = vset.pattern.permute.xlu1 (!%p294_p9), %v1016_v3  ;;  %v665_v5 = vld [vmem:[#allocation2] sm:$0x1] (!%p294_p9)  ;;  %s826_s8 = sshll.u32 (!%p294_p9), %s326_s10, 1  ;;  %s749_s25 = scalar_lea.sflag (!%p294_p9), [#allocation4], %s326_s10 }
  0x14   : > { %510 = vperm.xlu1 (!%p294_p9), %918, %v502_v62   ;;  %v599_v63 = vld [vmem:[%s1268_s6] sm:$0xff] (!%p294_p9) }
  0x16   : > { %505 = vperm.xlu0 (!%p294_p9), %917, %v501_v4  }
  0x18   : > { %s331_s27 = scalar_select %p330_p10, %s1117_s22, 63  ;;  %602 = vperm.xlu1 %918, %v599_v63  }
  0x1a   : > { %s828_s30 = sshll.u32 %s331_s27, 3  ;;  %668 = vperm.xlu0 %917, %v665_v5   ;;  %s1018_s27 = smov [#allocation3]  }
  0x1b   : > { %s1140_s15 = scalar_lea.vmem %s1262_s0, %s828_s30  ;;  %s956_s28 = sshll.u32 %s1018_s27, 4  ;;  %s957_s28 = int_to_ptr.vmem [resolvable:$false] %s956_s28 }
  0x1c   : > { %v353_v6 = vld [vmem:[%s1140_s15 + $0x80] sm:$0xff]  ;;  %v354_v7 = vld [vmem:[%s1140_s15 + $0x88] sm:$0xff]  ;;  %v355_v11 = vld [vmem:[%s1140_s15 + $0x90] sm:$0xff]  ;;  %s958_s29 = scalar_lea.vmem %s957_s28, 64 }
  0x1d   : > { %v337_v8 = vld [vmem:[%s1140_s15] sm:$0xff]  ;;  %v377_v9 = vpack.c.bf16 %v354_v7, %v353_v6  ;;  %v338_v10 = vld [vmem:[%s1140_s15 + $0x8] sm:$0xff]  ;;  %v356_v12 = vld [vmem:[%s1140_s15 + $0x98] sm:$0xff] }
  0x1e   : > { %v369_v13 = vpack.c.bf16 %v338_v10, %v337_v8  ;;  %v378_v14 = vpack.c.bf16 %v356_v12, %v355_v11  ;;  %v339_v15 = vld [vmem:[%s1140_s15 + $0x10] sm:$0xff]  ;;  %v340_v16 = vld [vmem:[%s1140_s15 + $0x18] sm:$0xff]  ;;  %v357_v19 = vld [vmem:[%s1140_s15 + $0xa0] sm:$0xff] }
  0x1f   : > { %868 = vmatprep.subr.msk.bf16.mxu0 %vm392_vm0, %v377_v9  ;;  %v370_v18 = vpack.c.bf16 %v340_v16, %v339_v15  ;;  %v358_v20 = vld [vmem:[%s1140_s15 + $0xa8] sm:$0xff]  ;;  %v341_v23 = vld [vmem:[%s1140_s15 + $0x20] sm:$0xff]  ;;  %v359_v26 = vld [vmem:[%s1140_s15 + $0xb0] sm:$0xff] }
  0x20   : > { %v397_v17 = vsel %vm392_vm0, %v369_v13, 0  ;;  %v379_v22 = vpack.c.bf16 %v358_v20, %v357_v19  ;;  %v342_v24 = vld [vmem:[%s1140_s15 + $0x28] sm:$0xff]  ;;  %v360_v27 = vld [vmem:[%s1140_s15 + $0xb8] sm:$0xff]  ;;  %v343_v30 = vld [vmem:[%s1140_s15 + $0x30] sm:$0xff] }
  0x21   : > { %851 = vmatpush3.bf16.xpose.msra.mxu0 %v397_v17  ;;  %v400_v21 = vsel %vm392_vm0, %v370_v18, 0  ;;  %v371_v25 = vpack.c.bf16 %v342_v24, %v341_v23  ;;  %v380_v29 = vpack.c.bf16 %v360_v27, %v359_v26  ;;  %v344_v31 = vld [vmem:[%s1140_s15 + $0x38] sm:$0xff]  ;;  %v361_v33 = vld [vmem:[%s1140_s15 + $0xc0] sm:$0xff]  ;;  %v362_v34 = vld [vmem:[%s1140_s15 + $0xc8] sm:$0xff] }
  0x22   : > { %869 = vmatprep.subr.msk.bf16.mxu0 %vm392_vm0, %v378_v14  ;;  %v372_v32 = vpack.c.bf16 %v344_v31, %v343_v30  ;;  %v381_v36 = vpack.c.bf16 %v362_v34, %v361_v33  ;;  %v345_v37 = vld [vmem:[%s1140_s15 + $0x40] sm:$0xff]  ;;  %v346_v38 = vld [vmem:[%s1140_s15 + $0x48] sm:$0xff]  ;;  %v363_v40 = vld [vmem:[%s1140_s15 + $0xd0] sm:$0xff] }
  0x23   : > { %v403_v28 = vsel %vm392_vm0, %v371_v25, 0  ;;  %v373_v39 = vpack.c.bf16 %v346_v38, %v345_v37  ;;  %v364_v41 = vld [vmem:[%s1140_s15 + $0xd8] sm:$0xff]  ;;  %v347_v44 = vld [vmem:[%s1140_s15 + $0x50] sm:$0xff]  ;;  %v365_v47 = vld [vmem:[%s1140_s15 + $0xe0] sm:$0xff] }
  0x24   : > { %v406_v35 = vsel %vm392_vm0, %v372_v32, 0  ;;  %v382_v43 = vpack.c.bf16 %v364_v41, %v363_v40  ;;  %v348_v45 = vld [vmem:[%s1140_s15 + $0x58] sm:$0xff]  ;;  %v366_v48 = vld [vmem:[%s1140_s15 + $0xe8] sm:$0xff]  ;;  %v349_v51 = vld [vmem:[%s1140_s15 + $0x60] sm:$0xff] }
  0x25   : > { %v409_v42 = vsel %vm392_vm0, %v373_v39, 0  ;;  %v374_v46 = vpack.c.bf16 %v348_v45, %v347_v44  ;;  %v383_v50 = vpack.c.bf16 %v366_v48, %v365_v47  ;;  %v350_v52 = vld [vmem:[%s1140_s15 + $0x68] sm:$0xff]  ;;  %v367_v54 = vld [vmem:[%s1140_s15 + $0xf0] sm:$0xff]  ;;  %v368_v55 = vld [vmem:[%s1140_s15 + $0xf8] sm:$0xff] }
  0x26   : > { %v375_v53 = vpack.c.bf16 %v350_v52, %v349_v51  ;;  %v384_v57 = vpack.c.bf16 %v368_v55, %v367_v54  ;;  %v351_v58 = vld [vmem:[%s1140_s15 + $0x70] sm:$0xff]  ;;  %v352_v59 = vld [vmem:[%s1140_s15 + $0x78] sm:$0xff]  ;;  %v919_v19 = vld [vmem:[%s1265_s3] sm:$0xff]   ;;  %s328_s15 = scalar_lea.vmem [#allocation3], %s826_s8 }
  0x27   : > { %v412_v49 = vsel %vm392_vm0, %v374_v46, 0  ;;  %v376_v60 = vpack.c.bf16 %v352_v59, %v351_v58  ;;  %v596_v48 = vld [vmem:[%s1267_s5] sm:$0xf]  ;;  %s763_s17 = sshll.u32 %s328_s15, 4  ;;  %s1222_s17 = int_to_ptr.vmem [resolvable:$true] %s763_s17 }
  0x28   : > { %v415_v56 = vsel %vm392_vm0, %v375_v53, 0  ;;  %s952_s26 = scalar_lea.vmem %s1222_s17, 32  ;;  %p959_p0 = scmp.lt.s32.totalorder %s1222_s17, %s957_s28 }
  0x29   : > { %853 = vmatpush3.bf16.xpose.msra.mxu0 %v400_v21  ;;  %v418_v61 = vsel %vm392_vm0, %v376_v60, 0  ;;  %p953_p11 = scmp.ne.s32.totalorder %s1222_s17, %s952_s26  ;;  %p960_p1 = scmp.lt.s32.totalorder %s958_s29, %s952_s26 }
  0x2a   : > { %870 = vmatprep.subr.msk.bf16.mxu0 %vm392_vm0, %v379_v22 }
  0x2b   : > { %p954_p12 = pnand %p953_p11, %p1107_p5  ;;  %p961_p2 = por %p960_p1, %p959_p0 }
  0x2d   : > { %p955_p13 = pneg %p954_p12 }
  0x2f   : > { %p962_p3 = pnand %p961_p2, %p955_p13 }
  0x31   : > { %855 = vmatpush3.bf16.xpose.msra.mxu0 %v403_v28 }
  0x32   : > { %871 = vmatprep.subr.msk.bf16.mxu0 %vm392_vm0, %v380_v29 }
  0x39   : > { %857 = vmatpush3.bf16.xpose.msra.mxu0 %v406_v35 }
  0x3a   : > { %872 = vmatprep.subr.msk.bf16.mxu0 %vm392_vm0, %v381_v36 }
  0x41   : > { %859 = vmatpush3.bf16.xpose.msra.mxu0 %v409_v42 }
  0x42   : > { %873 = vmatprep.subr.msk.bf16.mxu0 %vm392_vm0, %v382_v43 }
  0x49   : > { %861 = vmatpush3.bf16.xpose.msra.mxu0 %v412_v49 }
  0x4a   : > { %874 = vmatprep.subr.msk.bf16.mxu0 %vm392_vm0, %v383_v50 }
  0x51   : > { %863 = vmatpush3.bf16.xpose.msra.mxu0 %v415_v56 }
  0x52   : > { %875 = vmatprep.subr.msk.bf16.mxu0 %vm392_vm0, %v384_v57 }
  0x59   : > { %865 = vmatpush3.bf16.xpose.msra.mxu0 %v418_v61 }
  0x60   : > { %867 = vmatmul.mubr.msk.bf16.vlgmr.msra.gmra.mrb[0].mxu0 %vm392_vm0, %v1122_v1 }
  0x91   : > { %v390_v0 = vpop.permute.xlu0 %389 }
  0x93   : > { %v511_v24 = vpop.permute.xlu1 %510 }
  0x95   : > { %v506_v20 = vpop.permute.xlu0 %505 }
  0x97   : > { %v603_v49 = vpop.permute.xlu1 %602 }
 0x133   : > { %v478_v2 = vpop.f32.mrb[0].mxu0 }
 0x134   : > { %v479_v4 = vadd.f32 %v478_v2, %v390_v0  ;;  %v480_v5 = vpop.f32.mrb[1].mxu0 }
 0x135   : > { %v481_v6 = vadd.f32 %v480_v5, %v390_v0  ;;  %v482_v7 = vpop.f32.mrb[2].mxu0  ;;  %v671_v5 = vlaneseq }
 0x136   : > { %v830_v8 = vmul.f32 -1.442695, %v479_v4  ;;  %v483_v9 = vpop.f32.mrb[3].mxu0  ;;  %v662_v4 = vld [vmem:[%s1269_s7] sm:$0x1] }
 0x137   : > { %v831_v10 = vmul.f32 -1.442695, %v481_v6  ;;  %v672_v6 = vshrl.u32 %v671_v5, 7  ;;  %v1017_v7 = vmov 1966171168   ;;  %vm745_vm4 = vcmp.lt.s32.totalorder %v671_v5, 256 }
 0x138   : > { %920 = vpow2.f32 %v830_v8  ;;  %v729_v8 = vunpack.c.l.s4 %v1017_v7 }
 0x139   : > { %922 = vpow2.f32 %v831_v10  ;;  %v673_v9 = vsub.s32 0, %v672_v6  ;;  %v669_v10 = vpop.permute.xlu0 %668 }
 0x142   : > { %v921_v1 = vpop.eup %920 }
 0x143   : > { %v923_v11 = vpop.eup %922  ;;  %v491_v12 = vadd.f32 1.0, %v921_v1  ;;  %v730_v1 = vunpack.c.0.s8 %v729_v8 }
 0x144   : > { %v492_v13 = vadd.f32 1.0, %v923_v11  ;;  %v674_v11 = vrot.slane %v669_v10, %v673_v9 }
 0x145   : > { %924 = vrcp.f32 %v491_v12 }
 0x146   : > { %926 = vrcp.f32 %v492_v13 }
 0x14f   : > { %v925_v14 = vpop.eup %924 }
 0x150   : > { %v927_v15 = vpop.eup %926  ;;  %v499_v16 = vpack.c.bf16 %v925_v14, %v925_v14 }
 0x151   : > { %v500_v17 = vpack.c.bf16 %v927_v15, %v927_v15 }
 0x152   : > { %v524_v18 = vsel %vm522_vm1, %v499_v16, 0  ;;  %v733_v16 = vsub.s32 %v730_v1, %v672_v6 }
 0x153   : > { %833 = vmatprep.subr.msk.bf16.mxu1 %vm522_vm1, %v500_v17 }
 0x154   : > { %530 = vmatpush1.bf16.msra.mxu1 %v524_v18 }
 0x157   : > { %834 = vmatmul.mubr.msk.bf16.vlgmr.msra.gmra.mrb[0].mxu1 %vm518_vm2, %v919_v19 }
 0x158   : > { %641 = vmatprep.mubr.bf16.mxu1 %v1016_v3 }
 0x22a   : > { %v563_v21 = vpop.f32.mrb[0].mxu1 }
 0x22b   : > { %v564_v22 = vadd.f32 %v563_v21, %v506_v20  ;;  %v565_v23 = vpop.f32.mrb[1].mxu1 }
 0x22c   : > { %v566_v25 = vadd.f32 %v565_v23, %v506_v20  ;;  %v567_v26 = vpop.f32.mrb[2].mxu1 }
 0x22d   : > { %v835_v27 = vmul.f32 -1.442695, %v564_v22  ;;  %v568_v28 = vadd.f32 %v567_v26, %v511_v24  ;;  %v569_v29 = vpop.f32.mrb[3].mxu1 }
 0x22e   : > { %v836_v30 = vmul.f32 -1.442695, %v566_v25  ;;  %v570_v31 = vadd.f32 %v569_v29, %v511_v24 }
 0x22f   : > { %928 = vpow2.f32 %v835_v27  ;;  %v837_v32 = vmul.f32 -1.442695, %v568_v28 }
 0x230   : > { %930 = vpow2.f32 %v836_v30  ;;  %v838_v33 = vmul.f32 -1.442695, %v570_v31 }
 0x231   : > { %932 = vpow2.f32 %v837_v32 }
 0x232   : > { %934 = vpow2.f32 %v838_v33 }
 0x239   : > { %v929_v34 = vpop.eup %928 }
 0x23a   : > { %v931_v35 = vpop.eup %930  ;;  %v584_v36 = vadd.f32 1.0, %v929_v34 }
 0x23b   : > { %v933_v37 = vpop.eup %932  ;;  %v585_v38 = vadd.f32 1.0, %v931_v35 }
 0x23c   : > { %v935_v39 = vpop.eup %934  ;;  %936 = vrcp.f32 %v584_v36  ;;  %v586_v40 = vadd.f32 1.0, %v933_v37 }
 0x23d   : > { %938 = vrcp.f32 %v585_v38  ;;  %v587_v41 = vadd.f32 1.0, %v935_v39 }
 0x23e   : > { %940 = vrcp.f32 %v586_v40 }
 0x23f   : > { %942 = vrcp.f32 %v587_v41 }
 0x246   : > { %v937_v42 = vpop.eup %936 }
 0x247   : > { %v939_v43 = vpop.eup %938 }
 0x248   : > { %v941_v44 = vpop.eup %940 }
 0x249   : > { %v943_v45 = vpop.eup %942  ;;  %v597_v46 = vpack.c.bf16 %v941_v44, %v937_v42 }
 0x24a   : > { %v598_v47 = vpack.c.bf16 %v943_v45, %v939_v43 }
 0x24c   : > { %609 = vmatprep.subr.bf16.mxu1 %v598_v47 }
 0x24d   : > { %610 = vmatpush1.bf16.msra.mxu1 %v597_v46 }
 0x250   : > { %839 = vmatmul.mubr.msk.bf16.vlgmr.msra.gmra.mrb[4].mxu1 %vm605_vm3, %v596_v48 }
 0x251   : > { %716 = vmatprep.mubr.bf16.mxu1 %v1016_v3 }
 0x323   : > { %v643_v50 = vpop.f32.mrb[4].mxu1 }
 0x324   : > { %v644_v51 = vadd.f32 %v643_v50, %v603_v49  ;;  %v645_v52 = vpop.f32.mrb[5].mxu1 }
 0x325   : > { %v646_v53 = vadd.f32 %v645_v52, %v603_v49  ;;  %v647_v54 = vpop.f32.mrb[6].mxu1 }
 0x326   : > { %v840_v55 = vmul.f32 -1.442695, %v644_v51  ;;  %v648_v56 = vpop.f32.mrb[7].mxu1 }
 0x327   : > { %v841_v57 = vmul.f32 -1.442695, %v646_v53 }
 0x328   : > { %944 = vpow2.f32 %v840_v55 }
 0x329   : > { %946 = vpow2.f32 %v841_v57 }
 0x332   : > { %v945_v58 = vpop.eup %944 }
 0x333   : > { %v947_v59 = vpop.eup %946  ;;  %v656_v60 = vadd.f32 1.0, %v945_v58 }
 0x334   : > { %v657_v61 = vadd.f32 1.0, %v947_v59 }
 0x335   : > { %948 = vrcp.f32 %v656_v60 }
 0x336   : > { %950 = vrcp.f32 %v657_v61 }
 0x33f   : > { %v949_v62 = vpop.eup %948 }
 0x340   : > { %v951_v3 = vpop.eup %950  ;;  %v663_v63 = vpack.c.bf16 %v949_v62, %v949_v62 }
 0x341   : > { %v664_v0 = vpack.c.bf16 %v951_v3, %v951_v3 }
 0x342   : > { %v679_v2 = vsel %vm522_vm1, %v663_v63, 0 }
 0x343   : > { %842 = vmatprep.subr.msk.bf16.mxu1 %vm522_vm1, %v664_v0 }
 0x344   : > { %685 = vmatpush1.bf16.msra.mxu1 %v679_v2 }
 0x347   : > { %843 = vmatmul.mubr.msk.bf16.vlgmr.msra.gmra.mrb[8].mxu1 %vm518_vm2, %v662_v4 }
 0x41a   : > { %v718_v12 = vpop.f32.mrb[8].mxu1 }
 0x41b   : > { %v719_v13 = vadd.f32 %v718_v12, %v674_v11  ;;  %v720_v14 = vpop.f32.mrb[9].mxu1 }
 0x41c   : > { %v721_v15 = vadd.f32 %v720_v14, %v674_v11  ;;  %v722_v17 = vpop.f32.mrb[10].mxu1 }
 0x41d   : > { %v723_v18 = vpop.f32.mrb[11].mxu1 }
 0x41e   : > { %v727_v19 = vcombine.low %v719_v13, %v721_v15 }
 0x420   : > { %v734_v20 = vrot.slane %v727_v19, %v733_v16 }
 0x422   : > { %v741_v21 = vrot.slane %v734_v20, %v733_v16 }
 0x424   : > { %747 = vst.msk [vmem:[%s328_s15] sm:$0x3] %vm745_vm4, %v741_v21 }
 0x425   : > { %965 = shalt.err (!%p962_p3)
}
 0x426   : > { %s966_s22 = scalar_lea.hbm %s1220_s24, 32  ;;  %s970_s8 = scalar_lea.hbm %s1271_s9, 64 }
 0x427   : > { %p967_p4 = scmp.ne.s32.totalorder %s1220_s24, %s966_s22  ;;  %p971_p9 = scmp.lt.u32.totalorder %s1220_s24, %s1271_s9 }
 0x428   : > { %p972_p10 = scmp.lt.u32.totalorder %s970_s8, %s966_s22  ;;  %p974_p12 = scmp.lt.u32.totalorder %s966_s22, %s1220_s24 }
 0x429   : > { %p968_p7 = pnand %p967_p4, %p1107_p5 }
 0x42a   : > { %p973_p11 = por %p972_p10, %p971_p9 }
 0x42b   : > { %p969_p8 = pneg %p968_p7 }
 0x42c   : > { %p975_p13 = por %p974_p12, %p973_p11 }
 0x42e   : > { %p976_p0 = pnand %p975_p13, %p969_p8 }
 0x430   : > { %979 = shalt.err (!%p976_p0)
}
 0x431   : > { %876 = dma.vmem_to_hbm [thread:$0]  (%p1107_p5), %s1222_s17, 32, %s1220_s24, %s749_s25  }
 0x432 PF: > { %p882_p1 = scmp.ge.s32.totalorder %s1014_s14, 2  ;;  %s775_s23 = sand.u32 1, %s1002_s11  }
 0x433   : > { %s776_s26 = scalar_lea.sflag [#allocation4], %s775_s23 }
 0x434   : > { %p879_p2 = pnand %p882_p1, %p1111_p6 }
 0x436   : > { %997 = dma.done.wait (!%p879_p2), %s776_s26, 32  }
 0x437   : > { %999 = vsyncadd (!%p879_p2), %s776_s26, 4294967264  ;;  %p21_p3 = scmp.ge.s32.totalorder %s1095_s16, 4   ;;  %s1274_s11 = smov %s1006_s12 }
 0x438   : > { %s1275_s12 = smov %s1010_s13  ;;  %s1276_s13 = smov %s1105_s19 }
 0x439   : > { %s1277_s14 = smov %s1095_s16  ;;  %23 = sbr.rel (!%p21_p3) target bundleno = 6 (0x6), region = 91 }
 0x440   :  { %781 = vsyncpa [#allocation4], 1 }
 0x441   :  { %783 = vsyncpa [#allocation4 + $0x1], 1 }

</bundles_post_ra>
